<compile_context>
chip_gen: v7x
topology: tpu7x:2x2x1
jax: 0.10.0
libtpu: 0.0.40
codegen_flags: <defaults>
</compile_context>

<pallas_src>
import functools
import math

import jax
import jax.numpy as jnp
from jax.experimental import pallas as pl
from jax.experimental.pallas import tpu as pltpu

K_OUT = 64  # the module-level `k`


def _round_up(x, m):
    return (x + m - 1) // m * m


# ----------------------------------------------------------------------------
# Pallas kernel 1: tiled bf16 matmul, f32 accumulation, fused shift (+ ReLU)
# ----------------------------------------------------------------------------
def _mm_kernel(x_ref, w_ref, b_ref, o_ref, acc_ref, *, act):
    @pl.when(pl.program_id(2) == 0)
    def _():
        acc_ref[...] = jnp.zeros_like(acc_ref)

    acc_ref[...] += jnp.dot(x_ref[...], w_ref[...],
                            preferred_element_type=jnp.float32)

    @pl.when(pl.program_id(2) == pl.num_programs(2) - 1)
    def _():
        y = acc_ref[...] + b_ref[...]
        if act == "relu":
            y = jnp.maximum(y, 0.0)
        o_ref[...] = y.astype(o_ref.dtype)


def pallas_matmul_fused(x, w, shift, act="none"):
    """act((x @ w) + shift). x/w are fed to the MXU as bf16, accumulation is f32."""
    M, K = x.shape
    K2, N = w.shape
    assert K2 == K
    TM = min(256, _round_up(M, 16))
    TN = min(512, _round_up(N, 128))
    TK = _round_up(K, 128) if K <= 2048 else 2048
    Mp, Np, Kp = _round_up(M, TM), _round_up(N, TN), _round_up(K, TK)

    xb = x.astype(jnp.bfloat16)
    wb = w.astype(jnp.bfloat16)
    if (Mp, Kp) != (M, K):                      # pad only when actually needed
        xb = jnp.pad(xb, ((0, Mp - M), (0, Kp - K)))
    if (Kp, Np) != (K, N):
        wb = jnp.pad(wb, ((0, Kp - K), (0, Np - N)))
    sb = shift.astype(jnp.float32).reshape(1, -1)
    if Np != N:
        sb = jnp.pad(sb, ((0, 0), (0, Np - N)))

    out = pl.pallas_call(
        functools.partial(_mm_kernel, act=act),
        out_shape=jax.ShapeDtypeStruct((Mp, Np), jnp.float32),
        grid=(Mp // TM, Np // TN, Kp // TK),
        in_specs=[
            pl.BlockSpec((TM, TK), lambda i, j, kk: (i, kk)),
            pl.BlockSpec((TK, TN), lambda i, j, kk: (kk, j)),
            pl.BlockSpec((1, TN), lambda i, j, kk: (0, j)),
        ],
        out_specs=pl.BlockSpec((TM, TN), lambda i, j, kk: (i, j)),
        scratch_shapes=[pltpu.VMEM((TM, TN), jnp.float32)],
        compiler_params=pltpu.CompilerParams(
            dimension_semantics=("parallel", "parallel", "arbitrary")),
    )(xb, wb, sb)
    return out[:M, :N]


# ----------------------------------------------------------------------------
# Pallas kernel 2: DynamicWeights aggregation (group axis on the grid)
#   out[g*R+r, p] = sum_k U[g,k,r,p] * sigmoid(F[k,p]) * softmax_k(A[g,k,p])
# ----------------------------------------------------------------------------
def _dw_agg_kernel(u_ref, f_ref, a_ref, o_ref, *, K, R):
    f = jax.nn.sigmoid(f_ref[...])                       # [K, T]  (f32 on VPU/EUP)
    a = a_ref[0]                                          # [K, T]
    m = jnp.max(a, axis=0, keepdims=True)
    e = jnp.exp(a - m)
    soft = e / jnp.sum(e, axis=0, keepdims=True)
    wk = soft * f                                         # [K, T]
    acc = jnp.zeros(o_ref.shape, jnp.float32)
    for kk in range(K):
        acc = acc + u_ref[pl.ds(kk * R, R), :] * wk[kk:kk + 1, :]
    o_ref[...] = acc


@functools.partial(jax.jit, static_argnames=("G",))
def dw_aggregate(y_up, filt, aff, *, G):
    """y_up:[1,H,W,C*9] (chan=c*9+k), filt:[1,H,W,9], aff:[1,H,W,G*9] -> [1,H,W,C]."""
    N, H, W, CK = y_up.shape
    assert N == 1
    K = 9
    C = CK // K
    R = C // G
    HW = H * W
    T = 128
    HWp = _round_up(HW, T)

    # channel->row relayout (tiny at DW spatial sizes)
    U = y_up.reshape(HW, C, K).transpose(1, 2, 0)                       # [C, K, HW]
    U = U.reshape(G, R, K, HW).transpose(0, 2, 1, 3).reshape(G * K * R, HW)
    F = filt.reshape(HW, K).T                                           # [K, HW]
    A = aff.reshape(HW, G, K).transpose(1, 2, 0)                        # [G, K, HW]

    U = jnp.pad(U, ((0, 0), (0, HWp - HW)))
    F = jnp.pad(F, ((0, 0), (0, HWp - HW)))
    A = jnp.pad(A, ((0, 0), (0, 0), (0, HWp - HW)))

    out = pl.pallas_call(
        functools.partial(_dw_agg_kernel, K=K, R=R),
        out_shape=jax.ShapeDtypeStruct((C, HWp), jnp.float32),
        grid=(G, HWp // T),
        in_specs=[
            pl.BlockSpec((K * R, T), lambda g, t: (g, t)),
            pl.BlockSpec((K, T), lambda g, t: (0, t)),
            pl.BlockSpec((1, K, T), lambda g, t: (g, 0, t)),
        ],
        out_specs=pl.BlockSpec((R, T), lambda g, t: (g, t)),
        compiler_params=pltpu.CompilerParams(
            dimension_semantics=("parallel", "parallel")),
    )(U, F, A)
    return out[:, :HW].T.reshape(N, H, W, C)


# ----------------------------------------------------------------------------
# conv / deform-conv wrappers (im2col in JAX NHWC, matmul in Pallas)
# ----------------------------------------------------------------------------
def im2col_nhwc(x, kh, kw, stride, pad, dil):
    N, H, W, C = x.shape
    Ho = (H + 2 * pad - dil * (kh - 1) - 1) // stride + 1
    Wo = (W + 2 * pad - dil * (kw - 1) - 1) // stride + 1
    xp = jnp.pad(x, ((0, 0), (pad, pad), (pad, pad), (0, 0)))
    patches = []
    for i in range(kh):
        for j in range(kw):
            y0, x0 = i * dil, j * dil
            p = jax.lax.slice(
                xp, (0, y0, x0, 0),
                (N, y0 + (Ho - 1) * stride + 1, x0 + (Wo - 1) * stride + 1, C),
                (1, stride, stride, 1))
            patches.append(p)                               # [N, Ho, Wo, C]
    cols = jnp.concatenate(patches, axis=-1)                # (i,j) outer, C inner
    return cols.reshape(N * Ho * Wo, kh * kw * C), Ho, Wo


@functools.partial(jax.jit, static_argnames=("stride", "padding", "dilation", "act"))
def _conv2d_core(x, w, scale, shift, *, stride, padding, dilation, act):
    Cout, Cin, kh, kw = w.shape
    N = x.shape[0]
    cols, Ho, Wo = im2col_nhwc(x, kh, kw, stride, padding, dilation)
    wm = w.transpose(2, 3, 1, 0).reshape(kh * kw * Cin, Cout) * scale[None, :]
    y = pallas_matmul_fused(cols, wm, shift, act=act)
    return y.reshape(N, Ho, Wo, Cout)


def conv2d(x, w, b=None, stride=1, padding=0, dilation=1, bn=None, act="none"):
    """x is NHWC, w is PyTorch-layout [Cout, Cin, kh, kw]."""
    Cout = w.shape[0]
    scale = jnp.ones((Cout,), jnp.float32)
    shift = b if b is not None else jnp.zeros((Cout,), jnp.float32)
    if bn is not None:  # inference-mode BN folded into scale/shift
        s = bn["gamma"] / jnp.sqrt(bn["var"] + bn["eps"])
        shift = (shift - bn["mean"]) * s + bn["beta"]
        scale = s
    return _conv2d_core(x, w, scale, shift, stride=stride, padding=padding,
                        dilation=dilation, act=act)


@functools.partial(jax.jit, static_argnames=("padding",))
def _deform_conv2d_core(x, offset, w, shift, *, padding):
    """3x3, stride 1, dilation 1, one offset group, zero-padded bilinear sampling."""
    # TODO(synk): the data-dependent bilinear gather has no clean Pallas path; it
    #             runs as one fused XLA gather, the heavy matmul runs in Pallas.
    N, H, W, C = x.shape
    Cout = w.shape[0]
    K = 9
    off = offset.reshape(N, H, W, K, 2)                      # (dy, dx) per k
    dy, dx = off[..., 0], off[..., 1]
    ky = jnp.repeat(jnp.arange(3, dtype=jnp.float32), 3)
    kx = jnp.tile(jnp.arange(3, dtype=jnp.float32), 3)
    base_y = jnp.arange(H, dtype=jnp.float32)[None, :, None, None]
    base_x = jnp.arange(W, dtype=jnp.float32)[None, None, :, None]
    ys = base_y - padding + ky[None, None, None, :] + dy     # [N,H,W,K]
    xs = base_x - padding + kx[None, None, None, :] + dx
    y0 = jnp.floor(ys)
    x0 = jnp.floor(xs)
    wy1, wx1 = ys - y0, xs - x0
    wy0, wx0 = 1.0 - wy1, 1.0 - wx1

    # all four bilinear corners gathered in a single pass
    cy = jnp.stack([y0, y0, y0 + 1.0, y0 + 1.0], axis=1)     # [N,4,H,W,K]
    cx = jnp.stack([x0, x0 + 1.0, x0, x0 + 1.0], axis=1)
    cw = jnp.stack([wy0 * wx0, wy0 * wx1, wy1 * wx0, wy1 * wx1], axis=1)
    valid = (cy >= 0) & (cy <= H - 1) & (cx >= 0) & (cx <= W - 1)
    yi = jnp.clip(cy, 0, H - 1).astype(jnp.int32)
    xi = jnp.clip(cx, 0, W - 1).astype(jnp.int32)
    idx = (yi * W + xi).reshape(N, 4 * H * W * K)
    xflat = x.reshape(N, H * W, C)
    g = jax.vmap(lambda xf, ix: jnp.take(xf, ix, axis=0))(xflat, idx)
    g = g.reshape(N, 4, H, W, K, C)
    wgt = (cw * valid.astype(jnp.float32))[..., None]        # [N,4,H,W,K,1]
    val = jnp.sum(g * wgt, axis=1)                           # [N,H,W,K,C]
    cols = val.reshape(N * H * W, K * C)
    wm = w.transpose(2, 3, 1, 0).reshape(K * C, Cout)
    y = pallas_matmul_fused(cols, wm, shift, act="none")
    return y.reshape(N, H, W, Cout)


def deform_conv2d(x, offset, w, b=None, padding=1):
    Cout = w.shape[0]
    shift = b if b is not None else jnp.zeros((Cout,), jnp.float32)
    return _deform_conv2d_core(x, offset, w, shift, padding=padding)


def maxpool2(x):  # NHWC
    N, H, W, C = x.shape
    return x.reshape(N, H // 2, 2, W // 2, 2, C).max(axis=(2, 4))


def upsample2(x):  # nearest, scale 2, NHWC
    return jnp.repeat(jnp.repeat(x, 2, axis=1), 2, axis=2)


# ----------------------------------------------------------------------------
# deterministic parameter construction (PyTorch weight layout [Cout,Cin,kh,kw])
# ----------------------------------------------------------------------------
class KeyGen:
    def __init__(self, seed):
        self.key = jax.random.PRNGKey(seed)

    def __call__(self):
        self.key, sub = jax.random.split(self.key)
        return sub


_KG = KeyGen(0)


def init_conv(cin, cout, k, bias=True):
    fan = cin * k * k
    w = jax.random.normal(_KG(), (cout, cin, k, k), jnp.float32) / math.sqrt(fan)
    b = (jax.random.normal(_KG(), (cout,), jnp.float32) * 0.01) if bias else None
    return {"w": w, "b": b}


def init_bn(c):
    return {"gamma": jnp.ones((c,), jnp.float32), "beta": jnp.zeros((c,), jnp.float32),
            "mean": jnp.zeros((c,), jnp.float32), "var": jnp.ones((c,), jnp.float32),
            "eps": 1e-5}


# (cin, cout, kernel, padding, dilation) — matches the torch CP list exactly
CP_CFG = [
    [(64, 128, 3, 1, 1), (128, 128, 3, 1, 1), (128, K_OUT, 3, 1, 1)],
    [(64, 128, 3, 1, 1), (128, 128, 3, 1, 1), (128, K_OUT, 3, 1, 1)],
    [(256, 256, 5, 2, 1), (256, 256, 5, 2, 1), (256, K_OUT, 3, 1, 1)],
    [(512, 256, 5, 2, 1), (256, 256, 5, 2, 1), (256, K_OUT, 3, 1, 1)],
    [(1024, 512, 5, 2, 1), (512, 512, 5, 2, 1), (512, K_OUT, 3, 1, 1)],
    [(2048, 512, 7, 6, 2), (512, 512, 7, 6, 2), (512, K_OUT, 3, 1, 1)],
]


def init_cp(cfg):
    return [{"conv": init_conv(ci, co, kk), "pad": p, "dil": d}
            for (ci, co, kk, p, d) in cfg]


def init_warp(c, groups_k):
    return {"off": init_conv(c, 3 * 3 * 2 * 1 + 9, 3, bias=False),
            "def": init_conv(c, c, 3, bias=False),
            "c1": init_conv(c, 9 * groups_k, 3, bias=False),
            "bn": init_bn(9 * groups_k)}


def init_dw(channels, rgb_in, group):
    c = channels
    d = {"smooth": init_conv(rgb_in, c, 1, bias=False), "smooth_bn": init_bn(c),
         "scale2": init_conv(c * 4, rgb_in, 1, bias=True), "group": group}
    for i in (1, 2, 3):
        d[f"f{i}"] = init_warp(c, group)
        d[f"cat{i}"] = init_conv(c, 18, 3, bias=False)
        d[f"uf{i}"] = init_conv(c, c, 3, bias=True)
        d[f"up{i}"] = init_conv(c, c * 9, 1, bias=True)
    return d


def init_smooth(cin, cout=256):
    return {"conv": init_conv(cin, cout, 1, bias=False), "bn": init_bn(cout)}


def init_backbone():
    # TODO(synk): synthetic backbone standing in for the injected (ResNet) backbone.
    cfgs = [(3, 64, 2), (64, 256, 2), (256, 512, 2), (512, 1024, 2), (1024, 2048, 1)]
    return [{"conv": init_conv(ci, co, 3), "stride": s} for ci, co, s in cfgs]


def init_dmpn_params():
    return {
        "vgg": [init_conv(3, 64, 3), init_conv(64, 64, 3)],
        "cp": [init_cp(cfg) for cfg in CP_CFG],
        "backbone": init_backbone(),
        "dw2": init_dw(256, 512, 4),
        "dw3": init_dw(256, 1024, 4),
        "sd21": init_smooth(256), "sd22": init_smooth(512), "sd23": init_smooth(1024),
        "sd32": init_smooth(512), "sd33": init_smooth(1024), "sd34": init_smooth(2048),
    }


# ----------------------------------------------------------------------------
# module forward functions (all activations NHWC)
# ----------------------------------------------------------------------------
def cp_forward(layers, x):
    for l in layers:
        x = conv2d(x, l["conv"]["w"], l["conv"]["b"], padding=l["pad"],
                   dilation=l["dil"], act="relu")
    return x


def backbone_forward(p, x):
    feats = []
    for l in p:
        x = conv2d(x, l["conv"]["w"], l["conv"]["b"], stride=l["stride"],
                   padding=1, act="relu")
        feats.append(x)
    return feats


def smooth_forward(p, x):
    return conv2d(x, p["conv"]["w"], None, bn=p["bn"], act="relu")


def warp_forward(p, x):
    off_filt = conv2d(x, p["off"]["w"], None, padding=1)     # [N, H, W, 27]
    offset = off_filt[..., :18]
    filt = off_filt[..., -9:]
    out = deform_conv2d(x, offset, p["def"]["w"], None, padding=1)
    x = x + out
    aff = conv2d(x, p["c1"]["w"], None, padding=1, bn=p["bn"], act="relu")
    return aff, filt


def dw_forward(p, rgb_feat, d1, d2, d3):
    G = p["group"]
    rgb_org = rgb_feat
    x = conv2d(rgb_feat, p["smooth"]["w"], None, bn=p["smooth_bn"], act="relu")
    depths = [d1, d2, d3]
    outs = []
    for i in (1, 2, 3):
        aff, fw = warp_forward(p[f"f{i}"], depths[i - 1])
        off = conv2d(x, p[f"cat{i}"]["w"], None, padding=1)            # 18 channels
        u = deform_conv2d(x, off, p[f"uf{i}"]["w"], p[f"uf{i}"]["b"], padding=1)
        u = conv2d(u, p[f"up{i}"]["w"], p[f"up{i}"]["b"])              # 1x1 -> C*9
        outs.append(dw_aggregate(u, fw, aff, G=G))
    cat = jnp.concatenate([x] + outs, axis=-1)
    sc = conv2d(cat, p["scale2"]["w"], p["scale2"]["b"], act="relu")
    return jnp.concatenate([sc, rgb_org], axis=0)


def dmpn_forward(P, x_nchw):
    x = jnp.transpose(x_nchw, (0, 2, 3, 1))                  # NCHW -> NHWC (once)
    feats = []
    h = conv2d(x, P["vgg"][0]["w"], P["vgg"][0]["b"], padding=1, act="relu")
    h = conv2d(h, P["vgg"][1]["w"], P["vgg"][1]["b"], padding=1, act="relu")
    feats.append(cp_forward(P["cp"][0], h))

    xs = backbone_forward(P["backbone"], x)
    feats.append(cp_forward(P["cp"][1], xs[0]))
    feats.append(cp_forward(P["cp"][2], xs[1]))

    d1 = smooth_forward(P["sd21"], maxpool2(xs[1][1:2]))
    d2 = smooth_forward(P["sd22"], xs[2][1:2])
    d3 = smooth_forward(P["sd23"], upsample2(xs[3][1:2]))
    dw2 = dw_forward(P["dw2"], xs[2][0:1], d1, d2, d3)
    feats.append(cp_forward(P["cp"][3], dw2))

    d1 = smooth_forward(P["sd32"], maxpool2(xs[2][1:2]))
    d2 = smooth_forward(P["sd33"], xs[3][1:2])
    d3 = smooth_forward(P["sd34"], xs[4][1:2])
    dw3 = dw_forward(P["dw3"], xs[3][0:1], d1, d2, d3)
    feats.append(cp_forward(P["cp"][4], dw3))

    feats.append(cp_forward(P["cp"][5], xs[4]))
    return [jnp.transpose(f, (0, 3, 1, 2)) for f in feats]   # back to NCHW


if __name__ == "__main__":
    x = jax.random.normal(jax.random.PRNGKey(0), (2, 3, 16, 16), jnp.float32)
    params = init_dmpn_params()
    feats = dmpn_forward(params, x)
    for f in feats:
        jax.block_until_ready(f)
        assert bool(jnp.all(jnp.isfinite(f)))
    print("KERNEL_OK")
</pallas_src>

<mosaic_0001>
module attributes {stable_mosaic.version = 11 : i64} {
  func.func @_mm_kernel(%arg0: i32, %arg1: i32, %arg2: i32, %arg3: memref<256x128xbf16, #tpu.memory_space<vmem>>, %arg4: memref<128x128xbf16, #tpu.memory_space<vmem>>, %arg5: memref<1x128xf32, #tpu.memory_space<vmem>>, %arg6: memref<256x128xf32, #tpu.memory_space<vmem>>, %arg7: memref<256x128xf32, #tpu.memory_space<vmem>>) attributes {dimension_semantics = [#tpu.dimension_semantics<parallel>, #tpu.dimension_semantics<parallel>, #tpu.dimension_semantics<arbitrary>], iteration_bounds = array<i64: 2, 1, 1>, scalar_prefetch = 0 : i64, scratch_operands = 1 : i64, tpu.core_type = #tpu.core_type<tc>, window_params = [{transform_indices = @transform_0, window_bounds = array<i64: 256, 128>}, {transform_indices = @transform_1, window_bounds = array<i64: 128, 128>}, {transform_indices = @transform_2, window_bounds = array<i64: 1, 128>}, {transform_indices = @transform_3, window_bounds = array<i64: 256, 128>}]} {
    %c0_i32 = arith.constant 0 : i32
    %0 = arith.cmpi eq, %arg2, %c0_i32 : i32
    %1 = arith.extui %0 : i1 to i32
    %c0_i32_0 = arith.constant 0 : i32
    %2 = arith.cmpi ne, %1, %c0_i32_0 : i32
    scf.if %2 {
      %cst_10 = arith.constant 0.000000e+00 : f32
      %12 = vector.broadcast %cst_10 : f32 to vector<256x128xf32>
      %c0_11 = arith.constant 0 : index
      %c0_12 = arith.constant 0 : index
      %13 = vector.load %arg7[%c0_11, %c0_12] : memref<256x128xf32, #tpu.memory_space<vmem>>, vector<256x128xf32>
      tpu.vector_store %arg7[%c0_11, %c0_12], %12 {strides = array<i32>} : memref<256x128xf32, #tpu.memory_space<vmem>>, vector<256x128xf32>,
    } else {
    }
    %c0 = arith.constant 0 : index
    %c0_1 = arith.constant 0 : index
    %3 = vector.load %arg7[%c0, %c0_1] : memref<256x128xf32, #tpu.memory_space<vmem>>, vector<256x128xf32>
    %c0_2 = arith.constant 0 : index
    %c0_3 = arith.constant 0 : index
    %4 = vector.load %arg3[%c0_2, %c0_3] : memref<256x128xbf16, #tpu.memory_space<vmem>>, vector<256x128xbf16>
    %c0_4 = arith.constant 0 : index
    %c0_5 = arith.constant 0 : index
    %5 = vector.load %arg4[%c0_4, %c0_5] : memref<128x128xbf16, #tpu.memory_space<vmem>>, vector<128x128xbf16>
    %cst = arith.constant dense<0.000000e+00> : vector<256x128xf32>
    %6 = tpu.matmul %4, %5, %cst {dimension_numbers = #tpu.dot_dimension_numbers<[1], [0], [0], [1], [0, 0, 1, 1], [], []>} : vector<256x128xbf16>, vector<128x128xbf16>, vector<256x128xf32> -> vector<256x128xf32>
    %7 = arith.addf %3, %6 : vector<256x128xf32>
    %c0_6 = arith.constant 0 : index
    %c0_7 = arith.constant 0 : index
    %8 = vector.load %arg7[%c0_6, %c0_7] : memref<256x128xf32, #tpu.memory_space<vmem>>, vector<256x128xf32>
    tpu.vector_store %arg7[%c0_6, %c0_7], %7 {strides = array<i32>} : memref<256x128xf32, #tpu.memory_space<vmem>>, vector<256x128xf32>,
    %c0_i32_8 = arith.constant 0 : i32
    %9 = arith.cmpi eq, %arg2, %c0_i32_8 : i32
    %10 = arith.extui %9 : i1 to i32
    %c0_i32_9 = arith.constant 0 : i32
    %11 = arith.cmpi ne, %10, %c0_i32_9 : i32
    scf.if %11 {
      %c0_10 = arith.constant 0 : index
      %c0_11 = arith.constant 0 : index
      %12 = vector.load %arg7[%c0_10, %c0_11] : memref<256x128xf32, #tpu.memory_space<vmem>>, vector<256x128xf32>
      %c0_12 = arith.constant 0 : index
      %c0_13 = arith.constant 0 : index
      %13 = vector.load %arg5[%c0_12, %c0_13] : memref<1x128xf32, #tpu.memory_space<vmem>>, vector<1x128xf32>
      %14 = vector.broadcast %13 : vector<1x128xf32> to vector<256x128xf32>
      %15 = arith.addf %12, %14 : vector<256x128xf32>
      %cst_14 = arith.constant 0.000000e+00 : f32
      %16 = vector.broadcast %cst_14 : f32 to vector<256x128xf32>
      %17 = arith.maximumf %15, %16 : vector<256x128xf32>
      %c0_15 = arith.constant 0 : index
      %c0_16 = arith.constant 0 : index
      %18 = vector.load %arg6[%c0_15, %c0_16] : memref<256x128xf32, #tpu.memory_space<vmem>>, vector<256x128xf32>
      tpu.vector_store %arg6[%c0_15, %c0_16], %17 {strides = array<i32>} : memref<256x128xf32, #tpu.memory_space<vmem>>, vector<256x128xf32>,
    } else {
    }
    return
  }
  func.func @transform_0(%arg0: i32, %arg1: i32, %arg2: i32) -> (i32, i32) {
    %c0_i32 = arith.constant 0 : i32
    return %arg0, %arg2 : i32, i32
  }
  func.func @transform_1(%arg0: i32, %arg1: i32, %arg2: i32) -> (i32, i32) {
    %c0_i32 = arith.constant 0 : i32
    return %arg2, %arg1 : i32, i32
  }
  func.func @transform_2(%arg0: i32, %arg1: i32, %arg2: i32) -> (i32, i32) {
    %c0_i32 = arith.constant 0 : i32
    %c0_i32_0 = arith.constant 0 : i32
    return %c0_i32, %arg1 : i32, i32
  }
  func.func @transform_3(%arg0: i32, %arg1: i32, %arg2: i32) -> (i32, i32) {
    %c0_i32 = arith.constant 0 : i32
    return %arg0, %arg1 : i32, i32
  }
}

</mosaic_0001>

<bundles_post_ra>
// kernel: _conv2d_core.1
= control target key start
LH: loop header
LB: loop body
LE: loop exit
PB: predicated region body
PF: predicated region fallthrough
CT: control target
= control target key end

     0   :  { %8 = vsyncpa [#allocation4], 0  ;;  %s1543_s0 = inlined_call_operand.vmem [shape: bf16[512,128], index: 0, kind: input, shape index: {}]   ;;  %s1544_s1 = inlined_call_operand.vmem [shape: bf16[128,128], index: 1, kind: input, shape index: {}]   ;;  %s1545_s2 = inlined_call_operand.vmem [shape: f32[1,128], index: 2, kind: input, shape index: {}]   ;;  %s1546_s3 = inlined_call_operand.hbm [shape: f32[512,128], index: 3, kind: output, shape index: {}]  }
   0x1   :  { %10 = vsyncpa [#allocation4 + $0x1], 0  ;;  %s1311_s12 = smov 0   ;;  %s1313_s13 = smov 0  }
   0x2   :  { %s1315_s14 = smov 0   ;;  %s1317_s15 = smov 0  }
   0x3   :  { %s1319_s16 = smov 0   ;;  %s1321_s17 = smov 0  }
   0x4 LB: > { %s998_s18 = sadd.s32 4294967295, %s1286_s17   ;;  %s999_s19 = sadd.s32 4294967294, %s1286_s17   ;;  %s1286_s17 = sphi %s1321_s17, %s16_s17   ;;  %s1282_s16 = sphi %s1319_s16, %s1553_s16   ;;  %s1278_s15 = sphi %s1317_s15, %s1552_s15   ;;  %s1274_s14 = sphi %s1315_s14, %s1551_s14   ;;  %s1270_s13 = sphi %s1313_s13, %s1550_s13   ;;  %s1266_s12 = sphi %s1311_s12, %s1549_s12  }
   0x5   : > { %s35_s20 = sadd.s32 1, %s1282_s16  ;;  %s126_s21 = sadd.s32 1, %s1274_s14 }
   0x6   : > { %p37_p0 = scmp.ge.s32.totalorder %s35_s20, 2  ;;  %p136_p1 = scmp.ne.s32.totalorder %s1274_s14, %s1270_s13 }
   0x7   : > { %p137_p2 = scmp.eq.s32.totalorder %s998_s18, 1  ;;  %p142_p3 = scmp.ne.s32.totalorder %s1270_s13, %s1266_s12 }
   0x8   : > { %s1555_s20 = smov (%p37_p0, %s35_s20), 0  ;;  %p143_p5 = scmp.eq.s32.totalorder %s999_s19, 1 }
   0x9   : > { %p1351_p4 = por %p137_p2, %p136_p1  ;;  %s121_s23 = ssub.s32 %s1282_s16, %s1555_s20 }
   0xa   : > { %p1004_p6 = scmp.ge.s32.totalorder %s1286_s17, 1  ;;  %p124_p7 = scmp.eq.s32.totalorder %s121_s23, 0 }
   0xb   : > { %p1358_p8 = por %p143_p5, %p142_p3  ;;  %p191_p9 = scmp.lt.s32.totalorder %s1286_s17, 3 }
   0xc   : > { %s1364_s25 = scalar_select %p124_p7, %s1274_s14, %s126_s21  }
   0xd   : > { %p192_p10 = pnand %p1004_p6, %p191_p9 }
   0xe   : > { %v1184_v0 = vld [vmem:[%s1544_s1] sm:$0xff] (!%p192_p10)   ;;  %s1006_s28 = sshll.u32 (!%p192_p10), %s1278_s15, 5  ;;  %v1185_v1 = vld [vmem:[%s1544_s1 + $0x8] sm:$0xff] (!%p192_p10)   ;;  %v1186_v2 = vld [vmem:[%s1544_s1 + $0x10] sm:$0xff] (!%p192_p10)   ;;  %s226_s30 = sand.u32 (!%p192_p10), 1, %s1270_s13  }
   0xf   : > { %195 = sbr.rel (%p192_p10) target bundleno = 305 (0x131), region = 32  ;;  %p230_p11 = scmp.lt.s32.totalorder (!%p192_p10), %s1006_s28, 63  ;;  %1063 = vmatprep.subr.bf16.mxu0 (!%p192_p10), %v1184_v0  ;;  %1111 = vmatprep.subr.bf16.mxu1 (!%p192_p10), %v1184_v0  ;;  %v1187_v3 = vld [vmem:[%s1544_s1 + $0x18] sm:$0xff] (!%p192_p10)   ;;  %v1188_v6 = vld [vmem:[%s1544_s1 + $0x20] sm:$0xff] (!%p192_p10)   ;;  %v1189_v7 = vld [vmem:[%s1544_s1 + $0x28] sm:$0xff] (!%p192_p10)  }
  0x10   : > { %1064 = vmatpush3.bf16.msra.mxu0 (!%p192_p10), %v1184_v0  ;;  %1119 = vmatpush3.bf16.msra.mxu1 (!%p192_p10), %v1184_v0  ;;  %v1190_v8 = vld [vmem:[%s1544_s1 + $0x30] sm:$0xff] (!%p192_p10)   ;;  %v1191_v9 = vld [vmem:[%s1544_s1 + $0x38] sm:$0xff] (!%p192_p10)   ;;  %v1416_v24 = vld [vmem:[%s1545_s2] ss:$0 sm:$0xff] (!%p192_p10)  ;;  %s1038_s8 = sshll.u32 (!%p192_p10), %s1278_s15, 12  ;;  %s1497_s18 = scalar_lea.sflag (!%p192_p10), [#allocation4], %s226_s30 }
  0x11   : > { %1065 = vmatprep.subr.bf16.mxu0 (!%p192_p10), %v1185_v1  ;;  %1112 = vmatprep.subr.bf16.mxu1 (!%p192_p10), %v1185_v1  ;;  %s1485_s11 = scalar_lea.hbm (!%p192_p10), %s1546_s3, %s1038_s8  ;;  %s1288_s21 = smov (!%p192_p10), [#allocation3]  }
  0x12   : > { %s1212_s23 = sshll.u32 (!%p192_p10), %s1288_s21, 4  ;;  %s1213_s23 = int_to_ptr.vmem [resolvable:$false] %s1212_s23 }
  0x13   : > { %s1214_s26 = scalar_lea.vmem (!%p192_p10), %s1213_s23, 8192 }
  0x14   : > { %1066 = vmatpush3.bf16.msra.mxu0 (!%p192_p10), %v1185_v1  ;;  %1120 = vmatpush3.bf16.msra.mxu1 (!%p192_p10), %v1185_v1 }
  0x15   : > { %1067 = vmatprep.subr.bf16.mxu0 (!%p192_p10), %v1186_v2  ;;  %1113 = vmatprep.subr.bf16.mxu1 (!%p192_p10), %v1186_v2 }
  0x16   : > { %s1557_s28 = smov (!%p230_p11, %s1006_s28), 63 }
  0x17   : > { %s1007_s6 = sshll.u32 %s1557_s28, 2 }
  0x18   : > { %s1379_s9 = scalar_lea.vmem %s1543_s0, %s1007_s6  ;;  %1068 = vmatpush3.bf16.msra.mxu0 %v1186_v2  ;;  %1121 = vmatpush3.bf16.msra.mxu1 %v1186_v2  ;;  %s1005_s6 = sshll.u32 %s226_s30, 8 }
  0x19   : > { %v1192_v4 = vld [vmem:[%s1379_s9] sm:$0xff]   ;;  %1069 = vmatprep.subr.bf16.mxu0 %v1187_v3  ;;  %1114 = vmatprep.subr.bf16.mxu1 %v1187_v3  ;;  %v1194_v10 = vld [vmem:[%s1379_s9 + $0x8] sm:$0xff]   ;;  %v1196_v12 = vld [vmem:[%s1379_s9 + $0x10] sm:$0xff]   ;;  %s1428_s7 = scalar_lea.vmem [#allocation3], %s1005_s6 }
  0x1a   : > { %v1193_v5 = vld [vmem:[%s1379_s9 + $0x40] sm:$0xff]   ;;  %1079 = vmatprep.mubr.bf16.mxu0 %v1192_v4  ;;  %v1195_v11 = vld [vmem:[%s1379_s9 + $0x48] sm:$0xff]   ;;  %v1197_v13 = vld [vmem:[%s1379_s9 + $0x50] sm:$0xff]  }
  0x1b   : > { %1095 = vmatprep.mubr.bf16.mxu1 %v1193_v5  ;;  %v1198_v14 = vld [vmem:[%s1379_s9 + $0x18] sm:$0xff]   ;;  %v1200_v16 = vld [vmem:[%s1379_s9 + $0x20] sm:$0xff]   ;;  %v1202_v18 = vld [vmem:[%s1379_s9 + $0x28] sm:$0xff]  }
  0x1c   : > { %1070 = vmatpush3.bf16.msra.mxu0 %v1187_v3  ;;  %1122 = vmatpush3.bf16.msra.mxu1 %v1187_v3  ;;  %v1199_v15 = vld [vmem:[%s1379_s9 + $0x58] sm:$0xff]   ;;  %v1201_v17 = vld [vmem:[%s1379_s9 + $0x60] sm:$0xff]   ;;  %v1203_v19 = vld [vmem:[%s1379_s9 + $0x68] sm:$0xff]  }
  0x1d   : > { %1071 = vmatprep.subr.bf16.mxu0 %v1188_v6  ;;  %1115 = vmatprep.subr.bf16.mxu1 %v1188_v6  ;;  %v1204_v20 = vld [vmem:[%s1379_s9 + $0x30] sm:$0xff]   ;;  %v1206_v22 = vld [vmem:[%s1379_s9 + $0x38] sm:$0xff]  }
  0x1e   : > { %v1205_v21 = vld [vmem:[%s1379_s9 + $0x70] sm:$0xff]   ;;  %v1207_v23 = vld [vmem:[%s1379_s9 + $0x78] sm:$0xff]   ;;  %s890_s9 = sshll.u32 %s1428_s7, 4  ;;  %s1487_s9 = int_to_ptr.vmem [resolvable:$true] %s890_s9 }
  0x1f   : > { %s1208_s19 = scalar_lea.vmem %s1487_s9, 4096  ;;  %p1215_p1 = scmp.lt.s32.totalorder %s1487_s9, %s1213_s23 }
  0x20   : > { %1072 = vmatpush3.bf16.msra.mxu0 %v1188_v6  ;;  %1123 = vmatpush3.bf16.msra.mxu1 %v1188_v6  ;;  %p1209_p12 = scmp.ne.s32.totalorder %s1487_s9, %s1208_s19  ;;  %p1216_p2 = scmp.lt.s32.totalorder %s1214_s26, %s1208_s19 }
  0x21   : > { %1073 = vmatprep.subr.bf16.mxu0 %v1189_v7  ;;  %1116 = vmatprep.subr.bf16.mxu1 %v1189_v7 }
  0x22   : > { %p1210_p13 = pnand %p1209_p12, %p1351_p4  ;;  %p1217_p3 = por %p1216_p2, %p1215_p1 }
  0x24   : > { %1074 = vmatpush3.bf16.msra.mxu0 %v1189_v7  ;;  %1124 = vmatpush3.bf16.msra.mxu1 %v1189_v7  ;;  %p1211_p0 = pneg %p1210_p13 }
  0x25   : > { %1075 = vmatprep.subr.bf16.mxu0 %v1190_v8  ;;  %1117 = vmatprep.subr.bf16.mxu1 %v1190_v8 }
  0x26   : > { %p1218_p5 = pnand %p1217_p3, %p1211_p0 }
  0x28   : > { %1076 = vmatpush3.bf16.msra.mxu0 %v1190_v8  ;;  %1125 = vmatpush3.bf16.msra.mxu1 %v1190_v8 }
  0x29   : > { %1077 = vmatprep.subr.bf16.mxu0 %v1191_v9  ;;  %1118 = vmatprep.subr.bf16.mxu1 %v1191_v9 }
  0x2c   : > { %1078 = vmatpush3.bf16.msra.mxu0 %v1191_v9  ;;  %1126 = vmatpush3.bf16.msra.mxu1 %v1191_v9 }
  0x2f   : > { %1080 = vmatmul.mubr.bf16.vlgmr.msra.gmra.mrb[0].mxu0 %v1194_v10  ;;  %1096 = vmatmul.mubr.bf16.vlgmr.msra.gmra.mrb[0].mxu1 %v1195_v11 }
  0x30   : > { %1083 = vmatprep.mubr.bf16.mxu0 %v1196_v12  ;;  %1099 = vmatprep.mubr.bf16.mxu1 %v1197_v13 }
  0x37   : > { %1084 = vmatmul.mubr.bf16.gmra.mrb[4].mxu0 %v1198_v14  ;;  %1100 = vmatmul.mubr.bf16.gmra.mrb[4].mxu1 %v1199_v15 }
  0x38   : > { %1087 = vmatprep.mubr.bf16.mxu0 %v1200_v16  ;;  %1103 = vmatprep.mubr.bf16.mxu1 %v1201_v17 }
  0x3f   : > { %1088 = vmatmul.mubr.bf16.gmra.mrb[8].mxu0 %v1202_v18  ;;  %1104 = vmatmul.mubr.bf16.gmra.mrb[8].mxu1 %v1203_v19 }
  0x40   : > { %1091 = vmatprep.mubr.bf16.mxu0 %v1204_v20  ;;  %1107 = vmatprep.mubr.bf16.mxu1 %v1205_v21 }
  0x47   : > { %1092 = vmatmul.mubr.bf16.gmra.mrb[12].mxu0 %v1206_v22  ;;  %1108 = vmatmul.mubr.bf16.gmra.mrb[12].mxu1 %v1207_v23 }
 0x102   : > { %v1081_v25 = vpop.f32.mrb[0].mxu0  ;;  %v1097_v26 = vpop.f32.mrb[0].mxu1 }
 0x103   : > { %v781_v27 = vadd.f32 %v1081_v25, %v1416_v24  ;;  %v797_v28 = vadd.f32 %v1097_v26, %v1416_v24  ;;  %v546_v29 = vpop.f32.mrb[1].mxu0  ;;  %v610_v30 = vpop.f32.mrb[1].mxu1 }
 0x104   : > { %v779_v31 = vadd.f32 %v1416_v24, %v546_v29  ;;  %v795_v32 = vadd.f32 %v1416_v24, %v610_v30  ;;  %v1082_v33 = vpop.f32.mrb[2].mxu0  ;;  %v1098_v34 = vpop.f32.mrb[2].mxu1 }
 0x105   : > { %v813_v35 = vmax.f32 %v781_v27, 0.0  ;;  %v829_v36 = vmax.f32 %v797_v28, 0.0  ;;  %v782_v37 = vadd.f32 %v1082_v33, %v1416_v24  ;;  %v798_v38 = vadd.f32 %v1098_v34, %v1416_v24  ;;  %v549_v39 = vpop.f32.mrb[3].mxu0  ;;  %v613_v40 = vpop.f32.mrb[3].mxu1 }
 0x106   : > { %v811_v41 = vmax.f32 %v779_v31, 0.0  ;;  %v827_v42 = vmax.f32 %v795_v32, 0.0  ;;  %v780_v43 = vadd.f32 %v1416_v24, %v549_v39  ;;  %v796_v44 = vadd.f32 %v1416_v24, %v613_v40 }
 0x107   : > { %845 = vst [vmem:[%s1428_s7 + $0x10] sm:$0xff] %v813_v35  ;;  %861 = vst [vmem:[%s1428_s7 + $0x90] sm:$0xff] %v829_v36  ;;  %v814_v45 = vmax.f32 %v782_v37, 0.0  ;;  %v830_v46 = vmax.f32 %v798_v38, 0.0 }
 0x108   : > { %843 = vst [vmem:[%s1428_s7] sm:$0xff] %v811_v41  ;;  %859 = vst [vmem:[%s1428_s7 + $0x80] sm:$0xff] %v827_v42  ;;  %v812_v47 = vmax.f32 %v780_v43, 0.0  ;;  %v828_v48 = vmax.f32 %v796_v44, 0.0 }
 0x109   : > { %846 = vst [vmem:[%s1428_s7 + $0x18] sm:$0xff] %v814_v45  ;;  %862 = vst [vmem:[%s1428_s7 + $0x98] sm:$0xff] %v830_v46 }
 0x10a   : > { %844 = vst [vmem:[%s1428_s7 + $0x8] sm:$0xff] %v812_v47  ;;  %860 = vst [vmem:[%s1428_s7 + $0x88] sm:$0xff] %v828_v48  ;;  %v1085_v49 = vpop.f32.mrb[4].mxu0  ;;  %v1101_v50 = vpop.f32.mrb[4].mxu1 }
 0x10b   : > { %v785_v51 = vadd.f32 %v1085_v49, %v1416_v24  ;;  %v801_v52 = vadd.f32 %v1101_v50, %v1416_v24  ;;  %v562_v53 = vpop.f32.mrb[5].mxu0  ;;  %v626_v54 = vpop.f32.mrb[5].mxu1 }
 0x10c   : > { %v783_v55 = vadd.f32 %v1416_v24, %v562_v53  ;;  %v799_v56 = vadd.f32 %v1416_v24, %v626_v54  ;;  %v1086_v57 = vpop.f32.mrb[6].mxu0  ;;  %v1102_v58 = vpop.f32.mrb[6].mxu1 }
 0x10d   : > { %v817_v59 = vmax.f32 %v785_v51, 0.0  ;;  %v833_v60 = vmax.f32 %v801_v52, 0.0  ;;  %v786_v61 = vadd.f32 %v1086_v57, %v1416_v24  ;;  %v802_v62 = vadd.f32 %v1102_v58, %v1416_v24  ;;  %v565_v63 = vpop.f32.mrb[7].mxu0  ;;  %v629_v0 = vpop.f32.mrb[7].mxu1 }
 0x10e   : > { %v815_v1 = vmax.f32 %v783_v55, 0.0  ;;  %v831_v2 = vmax.f32 %v799_v56, 0.0  ;;  %v784_v3 = vadd.f32 %v1416_v24, %v565_v63  ;;  %v800_v4 = vadd.f32 %v1416_v24, %v629_v0 }
 0x10f   : > { %849 = vst [vmem:[%s1428_s7 + $0x30] sm:$0xff] %v817_v59  ;;  %865 = vst [vmem:[%s1428_s7 + $0xb0] sm:$0xff] %v833_v60  ;;  %v818_v5 = vmax.f32 %v786_v61, 0.0  ;;  %v834_v6 = vmax.f32 %v802_v62, 0.0 }
 0x110   : > { %847 = vst [vmem:[%s1428_s7 + $0x20] sm:$0xff] %v815_v1  ;;  %863 = vst [vmem:[%s1428_s7 + $0xa0] sm:$0xff] %v831_v2  ;;  %v816_v7 = vmax.f32 %v784_v3, 0.0  ;;  %v832_v8 = vmax.f32 %v800_v4, 0.0 }
 0x111   : > { %850 = vst [vmem:[%s1428_s7 + $0x38] sm:$0xff] %v818_v5  ;;  %866 = vst [vmem:[%s1428_s7 + $0xb8] sm:$0xff] %v834_v6 }
 0x112   : > { %848 = vst [vmem:[%s1428_s7 + $0x28] sm:$0xff] %v816_v7  ;;  %864 = vst [vmem:[%s1428_s7 + $0xa8] sm:$0xff] %v832_v8  ;;  %v1089_v9 = vpop.f32.mrb[8].mxu0  ;;  %v1105_v10 = vpop.f32.mrb[8].mxu1 }
 0x113   : > { %v789_v11 = vadd.f32 %v1089_v9, %v1416_v24  ;;  %v805_v12 = vadd.f32 %v1105_v10, %v1416_v24  ;;  %v578_v13 = vpop.f32.mrb[9].mxu0  ;;  %v642_v14 = vpop.f32.mrb[9].mxu1 }
 0x114   : > { %v787_v15 = vadd.f32 %v1416_v24, %v578_v13  ;;  %v803_v16 = vadd.f32 %v1416_v24, %v642_v14  ;;  %v1090_v17 = vpop.f32.mrb[10].mxu0  ;;  %v1106_v18 = vpop.f32.mrb[10].mxu1 }
 0x115   : > { %v821_v19 = vmax.f32 %v789_v11, 0.0  ;;  %v837_v20 = vmax.f32 %v805_v12, 0.0  ;;  %v790_v21 = vadd.f32 %v1090_v17, %v1416_v24  ;;  %v806_v22 = vadd.f32 %v1106_v18, %v1416_v24  ;;  %v581_v23 = vpop.f32.mrb[11].mxu0  ;;  %v645_v25 = vpop.f32.mrb[11].mxu1 }
 0x116   : > { %v819_v26 = vmax.f32 %v787_v15, 0.0  ;;  %v835_v27 = vmax.f32 %v803_v16, 0.0  ;;  %v788_v28 = vadd.f32 %v1416_v24, %v581_v23  ;;  %v804_v29 = vadd.f32 %v1416_v24, %v645_v25 }
 0x117   : > { %853 = vst [vmem:[%s1428_s7 + $0x50] sm:$0xff] %v821_v19  ;;  %869 = vst [vmem:[%s1428_s7 + $0xd0] sm:$0xff] %v837_v20  ;;  %v822_v30 = vmax.f32 %v790_v21, 0.0  ;;  %v838_v31 = vmax.f32 %v806_v22, 0.0 }
 0x118   : > { %851 = vst [vmem:[%s1428_s7 + $0x40] sm:$0xff] %v819_v26  ;;  %867 = vst [vmem:[%s1428_s7 + $0xc0] sm:$0xff] %v835_v27  ;;  %v820_v32 = vmax.f32 %v788_v28, 0.0  ;;  %v836_v33 = vmax.f32 %v804_v29, 0.0 }
 0x119   : > { %854 = vst [vmem:[%s1428_s7 + $0x58] sm:$0xff] %v822_v30  ;;  %870 = vst [vmem:[%s1428_s7 + $0xd8] sm:$0xff] %v838_v31 }
 0x11a   : > { %852 = vst [vmem:[%s1428_s7 + $0x48] sm:$0xff] %v820_v32  ;;  %868 = vst [vmem:[%s1428_s7 + $0xc8] sm:$0xff] %v836_v33  ;;  %v1093_v34 = vpop.f32.mrb[12].mxu0  ;;  %v1109_v35 = vpop.f32.mrb[12].mxu1 }
 0x11b   : > { %v793_v36 = vadd.f32 %v1093_v34, %v1416_v24  ;;  %v809_v37 = vadd.f32 %v1109_v35, %v1416_v24  ;;  %v594_v38 = vpop.f32.mrb[13].mxu0  ;;  %v658_v39 = vpop.f32.mrb[13].mxu1 }
 0x11c   : > { %v791_v40 = vadd.f32 %v1416_v24, %v594_v38  ;;  %v807_v41 = vadd.f32 %v1416_v24, %v658_v39  ;;  %v1094_v42 = vpop.f32.mrb[14].mxu0  ;;  %v1110_v43 = vpop.f32.mrb[14].mxu1 }
 0x11d   : > { %v825_v44 = vmax.f32 %v793_v36, 0.0  ;;  %v841_v45 = vmax.f32 %v809_v37, 0.0  ;;  %v794_v46 = vadd.f32 %v1094_v42, %v1416_v24  ;;  %v810_v47 = vadd.f32 %v1110_v43, %v1416_v24  ;;  %v597_v48 = vpop.f32.mrb[15].mxu0  ;;  %v661_v49 = vpop.f32.mrb[15].mxu1 }
 0x11e   : > { %v823_v50 = vmax.f32 %v791_v40, 0.0  ;;  %v839_v51 = vmax.f32 %v807_v41, 0.0  ;;  %v792_v52 = vadd.f32 %v1416_v24, %v597_v48  ;;  %v808_v53 = vadd.f32 %v1416_v24, %v661_v49 }
 0x11f   : > { %857 = vst [vmem:[%s1428_s7 + $0x70] sm:$0xff] %v825_v44  ;;  %873 = vst [vmem:[%s1428_s7 + $0xf0] sm:$0xff] %v841_v45  ;;  %v826_v54 = vmax.f32 %v794_v46, 0.0  ;;  %v842_v55 = vmax.f32 %v810_v47, 0.0 }
 0x120   : > { %855 = vst [vmem:[%s1428_s7 + $0x60] sm:$0xff] %v823_v50  ;;  %871 = vst [vmem:[%s1428_s7 + $0xe0] sm:$0xff] %v839_v51  ;;  %v824_v56 = vmax.f32 %v792_v52, 0.0  ;;  %v840_v57 = vmax.f32 %v808_v53, 0.0 }
 0x121   : > { %858 = vst [vmem:[%s1428_s7 + $0x78] sm:$0xff] %v826_v54  ;;  %874 = vst [vmem:[%s1428_s7 + $0xf8] sm:$0xff] %v842_v55 }
 0x122   : > { %856 = vst [vmem:[%s1428_s7 + $0x68] sm:$0xff] %v824_v56  ;;  %872 = vst [vmem:[%s1428_s7 + $0xe8] sm:$0xff] %v840_v57 }
 0x123   : > { %1221 = shalt.err (!%p1218_p5)
}
 0x124   : > { %s1222_s27 = scalar_lea.hbm %s1485_s11, 4096  ;;  %s1226_s30 = scalar_lea.hbm %s1546_s3, 8192 }
 0x125   : > { %p1223_p6 = scmp.ne.s32.totalorder %s1485_s11, %s1222_s27  ;;  %p1227_p10 = scmp.lt.u32.totalorder %s1485_s11, %s1546_s3 }
 0x126   : > { %p1228_p11 = scmp.lt.u32.totalorder %s1226_s30, %s1222_s27  ;;  %p1230_p13 = scmp.lt.u32.totalorder %s1222_s27, %s1485_s11 }
 0x127   : > { %p1224_p7 = pnand %p1223_p6, %p1351_p4 }
 0x128   : > { %p1229_p12 = por %p1228_p11, %p1227_p10 }
 0x129   : > { %p1225_p9 = pneg %p1224_p7 }
 0x12a   : > { %p1231_p0 = por %p1230_p13, %p1229_p12 }
 0x12c   : > { %p1232_p1 = pnand %p1231_p0, %p1225_p9 }
 0x12e   : > { %1235 = shalt.err (!%p1232_p1)
}
 0x12f   : > { %s1289_s6 = smov 128   ;;  %s1290_s7 = smov 8  }
 0x130   : > { %1127 = dma.vmem_to_hbm [thread:$0]  (%p1351_p4), %s1487_s9, 4096, %s1485_s11, %s1497_s18, %s1289_s6, %s1289_s6, %s1290_s7  }
 0x131 PF: > { %p1133_p2 = scmp.ge.s32.totalorder %s1286_s17, 2  ;;  %s905_s8 = sand.u32 1, %s1266_s12  }
 0x132   : > { %s906_s15 = scalar_lea.sflag [#allocation4], %s905_s8 }
 0x133   : > { %p1130_p3 = pnand %p1133_p2, %p1358_p8 }
 0x135   : > { %1261 = dma.done.wait (!%p1130_p3), %s906_s15, 4096  }
 0x136   : > { %1263 = vsyncadd (!%p1130_p3), %s906_s15, 4294963200  ;;  %s16_s17 = sadd.s32 1, %s1286_s17   ;;  %s1549_s12 = smov %s1270_s13 }
 0x137   : > { %p13_p5 = scmp.ge.s32.totalorder %s16_s17, 4   ;;  %s1550_s13 = smov %s1274_s14 }
 0x138   : > { %s1551_s14 = smov %s1364_s25  ;;  %s1552_s15 = smov %s1282_s16 }
 0x139   : > { %s1553_s16 = smov %s1555_s20  ;;  %15 = sbr.rel (!%p13_p5) target bundleno = 4 (0x4), region = 81 }
 0x140   :  { %911 = vsyncpa [#allocation4], 1 }
 0x141   :  { %913 = vsyncpa [#allocation4 + $0x1], 1 }

</bundles_post_ra>
